<compile_context>
chip_gen: v7x
topology: tpu7x:2x2x1
jax: 0.10.0
libtpu: 0.0.40
codegen_flags: <defaults>
</compile_context>

<pallas_src>
import functools

import jax
import jax.numpy as jnp
from jax.experimental import pallas as pl
from jax.experimental.pallas import tpu as pltpu

BN_EPS = 1e-5
MXU_ALIGN = 128
VMEM_LIMIT = 48 * 1024 * 1024      # safe on v5e/v6e (128 MiB) and v7x (64 MiB)
VMEM_BUDGET = 40 * 1024 * 1024     # per-step working-set target (headroom kept)


def _round_up(x, m):
    return (x + m - 1) // m * m


def _select_tiles(M, N, K):
    """Shape-adaptive, 128-aligned tile selection sized for v7x VMEM."""
    # N tile: lane-dense; keep >= 2 tiles on the megacore-parallel axis if we can.
    n_full = _round_up(N, MXU_ALIGN)
    tn = min(1024, n_full)
    if n_full // tn < 2 and tn >= 256:
        tn //= 2
    n_pad = _round_up(N, tn)

    # K tile (reduction axis, innermost grid dim).
    tk = min(1024, _round_up(K, MXU_ALIGN))
    k_pad = _round_up(K, tk)

    # M tile: single M tile when M is modest -> the weight slab (dominant HBM
    # stream for small-M / ROI-head shapes) is streamed exactly once.
    m_full = _round_up(M, MXU_ALIGN)
    tm = m_full if m_full <= 2048 else 1024

    def vmem_bytes(tm_):
        return (2 * tm_ * tk * 2      # LHS blocks (bf16, double-buffered)
                + 2 * tk * tn * 2     # RHS blocks (bf16, double-buffered)
                + tm_ * tn * 4        # f32 accumulator scratch
                + 2 * tm_ * tn * 2    # bf16 output blocks (double-buffered)
                + 8 * tn * 4)         # stats blocks
    while vmem_bytes(tm) > VMEM_BUDGET and tm >= 256:
        tm //= 2
    m_pad = _round_up(M, tm)
    return tm, tn, tk, m_pad, n_pad, k_pad


# ----------------------------------------------------------------------------
# Pass 1: tiled matmul + fused per-channel sum / sum-of-squares (BN stats),
#         optionally with the *previous* layer's BN+ReLU fused onto the LHS.
# ----------------------------------------------------------------------------
def _matmul_stats_kernel(*refs, fuse_lhs, m_true):
    # grid = (j: N tiles [parallel], i: M tiles [arbitrary], k: K tiles [arbitrary])
    if fuse_lhs:
        p_ref, w_ref, s_ref, b_ref, o_ref, sum_ref, sq_ref, acc_ref = refs
    else:
        p_ref, w_ref, o_ref, sum_ref, sq_ref, acc_ref = refs

    i = pl.program_id(1)
    k = pl.program_id(2)
    tm = p_ref.shape[0]

    # Stats blocks are resident across the whole (i, k) sweep for a given j.
    @pl.when((i == 0) & (k == 0))
    def _():
        sum_ref[...] = jnp.zeros_like(sum_ref)
        sq_ref[...] = jnp.zeros_like(sq_ref)

    @pl.when(k == 0)
    def _():
        acc_ref[...] = jnp.zeros_like(acc_ref)

    if fuse_lhs:
        # Previous layer's BatchNorm + ReLU applied per K column (scale/shift
        # repeat the per-Cin params over the 9 taps).  VPU work only; hidden
        # under the MXU.
        lhs = jnp.maximum(
            p_ref[...].astype(jnp.float32) * s_ref[...] + b_ref[...], 0.0)
        if m_true % tm != 0:
            # Zero out pad M rows (relu(shift) != 0) so BN stats stay exact.
            rows = jax.lax.broadcasted_iota(jnp.int32, lhs.shape, 0)
            lhs = jnp.where(rows < (m_true - i * tm), lhs, 0.0)
        lhs = lhs.astype(jnp.bfloat16)
    else:
        lhs = p_ref[...]

    acc_ref[...] += jnp.dot(lhs, w_ref[...], preferred_element_type=jnp.float32)

    @pl.when(k == pl.num_programs(2) - 1)
    def _():
        acc = acc_ref[...]
        o_ref[...] = acc.astype(o_ref.dtype)          # bf16 writeback
        sum_ref[...] += jnp.sum(acc, axis=0, keepdims=True)
        sq_ref[...] += jnp.sum(acc * acc, axis=0, keepdims=True)


# ----------------------------------------------------------------------------
# Pass 2 (final layer only): elementwise BN apply (scale/shift) + ReLU
# ----------------------------------------------------------------------------
def _bn_relu_kernel(x_ref, scale_ref, shift_ref, o_ref):
    y = x_ref[...].astype(jnp.float32) * scale_ref[...] + shift_ref[...]
    o_ref[...] = jnp.maximum(y, 0.0).astype(o_ref.dtype)


def _extract_patches_nhwc(x, ksize, stride):
    """im2col glue (pure layout work, no math). Column order (kh, kw, cin)."""
    B, H, W, C = x.shape
    Ho = (H - ksize) // stride + 1
    Wo = (W - ksize) // stride + 1
    cols = []
    for kh in range(ksize):
        for kw in range(ksize):
            cols.append(
                x[:, kh:kh + stride * Ho:stride, kw:kw + stride * Wo:stride, :])
    patches = jnp.concatenate(cols, axis=-1)                 # [B, Ho, Wo, k*k*C]
    return patches.reshape(B * Ho * Wo, ksize * ksize * C), (B, Ho, Wo)


def _conv_matmul_stats(patches, w2d, *, lhs_scale=None, lhs_shift=None):
    """One conv layer as matmul + fused BN-stats (pass 1).

    Optionally fuses the *previous* layer's BN+ReLU onto the LHS tiles
    (lhs_scale/lhs_shift are per-K-column vectors of length K).
    Returns (conv_raw_bf16[m_pad, n_pad], mean[1, n_pad], var[1, n_pad], meta).
    """
    M, K = patches.shape
    Kw, N = w2d.shape
    assert Kw == K
    tm, tn, tk, m_pad, n_pad, k_pad = _select_tiles(M, N, K)

    # Zero-pad to tile multiples (pad rows/cols contribute exactly 0; pad M
    # rows are additionally masked in-kernel on the fused-LHS path).
    patches = jnp.pad(patches.astype(jnp.bfloat16),
                      ((0, m_pad - M), (0, k_pad - K)))
    w2d = jnp.pad(w2d.astype(jnp.bfloat16), ((0, k_pad - K), (0, n_pad - N)))

    fuse = lhs_scale is not None
    grid = (n_pad // tn, m_pad // tm, k_pad // tk)

    in_specs = [
        pl.BlockSpec((tm, tk), lambda j, i, k: (i, k)),
        pl.BlockSpec((tk, tn), lambda j, i, k: (k, j)),
    ]
    args = [patches, w2d]
    if fuse:
        s = jnp.pad(lhs_scale.reshape(1, -1).astype(jnp.float32),
                    ((0, 0), (0, k_pad - K)))
        b = jnp.pad(lhs_shift.reshape(1, -1).astype(jnp.float32),
                    ((0, 0), (0, k_pad - K)))
        in_specs += [pl.BlockSpec((1, tk), lambda j, i, k: (0, k)),
                     pl.BlockSpec((1, tk), lambda j, i, k: (0, k))]
        args += [s, b]

    kernel = functools.partial(_matmul_stats_kernel, fuse_lhs=fuse, m_true=M)

    conv_raw, ch_sum, ch_sq = pl.pallas_call(
        kernel,
        out_shape=(
            jax.ShapeDtypeStruct((m_pad, n_pad), jnp.bfloat16),
            jax.ShapeDtypeStruct((1, n_pad), jnp.float32),
            jax.ShapeDtypeStruct((1, n_pad), jnp.float32),
        ),
        grid=grid,
        in_specs=in_specs,
        out_specs=(
            pl.BlockSpec((tm, tn), lambda j, i, k: (i, j)),
            pl.BlockSpec((1, tn), lambda j, i, k: (0, j)),
            pl.BlockSpec((1, tn), lambda j, i, k: (0, j)),
        ),
        scratch_shapes=[pltpu.VMEM((tm, tn), jnp.float32)],
        compiler_params=pltpu.CompilerParams(
            dimension_semantics=("parallel", "arbitrary", "arbitrary"),
            vmem_limit_bytes=VMEM_LIMIT,
        ),
        cost_estimate=pl.CostEstimate(
            flops=2 * m_pad * k_pad * n_pad,
            transcendentals=0,
            # Includes the actual re-stream factors: LHS is re-read per N tile,
            # weights are re-read per M tile.
            bytes_accessed=((n_pad // tn) * m_pad * k_pad * 2
                            + (m_pad // tm) * k_pad * n_pad * 2
                            + m_pad * n_pad * 2 + 2 * n_pad * 4),
        ),
    )(*args)

    # BatchNorm batch statistics over the TRUE (unpadded) rows: pad rows are
    # exactly zero, so dividing by the true count keeps mean / (biased) var exact.
    # TODO(synk): E[X^2]-E[X]^2 in f32 can lose precision if |mean| >> std for a
    #             real checkpoint; a shifted-sum formulation would be safer.
    m_true = jnp.float32(M)
    mean = ch_sum / m_true
    var = jnp.maximum(ch_sq / m_true - mean * mean, 0.0)
    return conv_raw, mean, var, (M, N, m_pad, n_pad, tm)


def _bn_affine(mean, var, gamma, beta, n_pad):
    """Fold BN(batch stats) + affine into y = x*scale + shift (f32 [1, n_pad])."""
    inv = jax.lax.rsqrt(var + BN_EPS)
    n_true = gamma.shape[0]
    gamma_p = jnp.pad(gamma.astype(jnp.float32), (0, n_pad - n_true),
                      constant_values=1.0).reshape(1, n_pad)
    beta_p = jnp.pad(beta.astype(jnp.float32),
                     (0, n_pad - n_true)).reshape(1, n_pad)
    scale = gamma_p * inv
    shift = beta_p - mean * scale
    return scale, shift


def _bn_relu_apply(x_pad, scale, shift, tm, out_dtype):
    """Lane-dense elementwise BN apply + ReLU over the padded [m_pad, n_pad] slab."""
    m_pad, n_pad = x_pad.shape
    # Shrink the row tile if the bf16-in + out blocks would blow the VMEM budget.
    while (tm > 128 and tm * n_pad * 12 > VMEM_BUDGET
           and m_pad % (tm // 2) == 0):
        tm //= 2
    return pl.pallas_call(
        _bn_relu_kernel,
        out_shape=jax.ShapeDtypeStruct((m_pad, n_pad), out_dtype),
        grid=(m_pad // tm,),
        in_specs=[
            pl.BlockSpec((tm, n_pad), lambda i: (i, 0)),
            pl.BlockSpec((1, n_pad), lambda i: (0, 0)),
            pl.BlockSpec((1, n_pad), lambda i: (0, 0)),
        ],
        out_specs=pl.BlockSpec((tm, n_pad), lambda i: (i, 0)),
        compiler_params=pltpu.CompilerParams(
            dimension_semantics=("parallel",),
            vmem_limit_bytes=VMEM_LIMIT,
        ),
    )(x_pad, scale, shift)


class PersonFeatureExtractorPallas:
    """Deterministically-initialized Pallas port of PersonFeatureExtractor."""

    def __init__(self, in_channel=4352, out_channel=1024, mid_channel=2048,
                 key=jax.random.PRNGKey(0)):
        k1, k2, k3, k4 = jax.random.split(key, 4)
        fan1 = in_channel * 9
        fan2 = mid_channel * 9
        b1 = 1.0 / jnp.sqrt(fan1)
        b2 = 1.0 / jnp.sqrt(fan2)
        self.w1 = jax.random.uniform(k1, (mid_channel, in_channel, 3, 3),
                                     jnp.float32, -b1, b1)
        self.w2 = jax.random.uniform(k3, (out_channel, mid_channel, 3, 3),
                                     jnp.float32, -b2, b2)
        # Conv biases exist in the reference module but are a mathematical
        # no-op under training-mode BatchNorm (cancelled by mean subtraction);
        # kept only for parameter parity, never applied.
        self.cb1 = jax.random.uniform(k2, (mid_channel,), jnp.float32, -b1, b1)
        self.cb2 = jax.random.uniform(k4, (out_channel,), jnp.float32, -b2, b2)
        # BatchNorm affine params (PyTorch default init: weight=1, bias=0).
        self.g1 = jnp.ones((mid_channel,), jnp.float32)
        self.be1 = jnp.zeros((mid_channel,), jnp.float32)
        self.g2 = jnp.ones((out_channel,), jnp.float32)
        self.be2 = jnp.zeros((out_channel,), jnp.float32)

    def __call__(self, x_nchw):
        x = jnp.transpose(x_nchw, (0, 2, 3, 1)).astype(jnp.bfloat16)  # NHWC

        # ---- layer 1: conv1(s2) matmul + fused BN1 batch-stats --------------
        p1, (B, H1, W1) = _extract_patches_nhwc(x, 3, 2)
        w1_2d = jnp.transpose(self.w1, (2, 3, 1, 0)).reshape(
            -1, self.w1.shape[0])                             # [9*Cin, Cmid]
        conv1, mean1, var1, (M1, N1, _, n1p, _) = _conv_matmul_stats(p1, w1_2d)
        scale1, shift1 = _bn_affine(mean1, var1, self.g1, self.be1, n1p)

        # Raw (pre-BN) conv1 activation feeds layer 2; BN1 + ReLU1 are fused
        # into layer 2's matmul LHS path (no extra inter-layer HBM round trip).
        act1 = conv1[:M1, :N1].reshape(B, H1, W1, N1)         # bf16

        # ---- layer 2: conv2(s1) matmul + fused BN1-apply + BN2 batch-stats --
        p2, (B2, H2, W2) = _extract_patches_nhwc(act1, 3, 1)
        w2_2d = jnp.transpose(self.w2, (2, 3, 1, 0)).reshape(
            -1, self.w2.shape[0])                             # [9*Cmid, Cout]
        sc_k = jnp.tile(scale1[:, :N1], (1, 9))               # (kh, kw, cin) order
        sh_k = jnp.tile(shift1[:, :N1], (1, 9))
        conv2, mean2, var2, (M2, N2, _, n2p, tm2) = _conv_matmul_stats(
            p2, w2_2d, lhs_scale=sc_k, lhs_shift=sh_k)
        scale2, shift2 = _bn_affine(mean2, var2, self.g2, self.be2, n2p)

        # ---- final BN2 apply + ReLU (only remaining elementwise pass) --------
        y = _bn_relu_apply(conv2, scale2, shift2, tm2, jnp.float32)
        y = y[:M2, :N2].reshape(B2, H2, W2, N2)
        return jnp.transpose(y, (0, 3, 1, 2))                 # NHWC -> NCHW


def _reference_forward(x, model):
    """Pure-JAX f32 reference matching the PyTorch module in training mode."""
    def conv(x, w, b, stride):
        y = jax.lax.conv_general_dilated(
            x, w, window_strides=(stride, stride), padding="VALID",
            dimension_numbers=("NCHW", "OIHW", "NCHW"))
        return y + b.reshape(1, -1, 1, 1)

    def bn_relu(y, gamma, beta):
        mean = jnp.mean(y, axis=(0, 2, 3), keepdims=True)
        var = jnp.mean((y - mean) ** 2, axis=(0, 2, 3), keepdims=True)
        yn = (y - mean) * jax.lax.rsqrt(var + BN_EPS)
        yn = yn * gamma.reshape(1, -1, 1, 1) + beta.reshape(1, -1, 1, 1)
        return jnp.maximum(yn, 0.0)

    y = bn_relu(conv(x, model.w1, model.cb1, 2), model.g1, model.be1)
    y = bn_relu(conv(y, model.w2, model.cb2, 1), model.g2, model.be2)
    return y


if __name__ == "__main__":
    key = jax.random.PRNGKey(0)
    kx, kp = jax.random.split(key)
    # Small shapes consistent with the module structure:
    # batch=2, in_channel=16, mid_channel=32, out_channel=24, spatial=9x9.
    B, Cin, H, W = 2, 16, 9, 9
    x = jax.random.normal(kx, (B, Cin, H, W), jnp.float32)

    model = PersonFeatureExtractorPallas(in_channel=Cin, out_channel=24,
                                         mid_channel=32, key=kp)
    out = model(x)
    out = jax.block_until_ready(out)

    # conv1(s2): 9 -> 4 ; conv2(s1): 4 -> 2  =>  [2, 24, 2, 2]
    assert out.shape == (B, 24, 2, 2), out.shape
    assert bool(jnp.all(out >= 0.0)) and bool(jnp.isfinite(out).all())

    # Loose numerical check vs. f32 reference (kernel computes in bf16).
    ref = jax.block_until_ready(_reference_forward(x, model))
    max_err = float(jnp.max(jnp.abs(out - ref)))
    assert max_err < 0.25, f"max abs error {max_err}"

    print("KERNEL_OK")
</pallas_src>

<mosaic_0001>
module attributes {stable_mosaic.version = 11 : i64} {
  func.func @_matmul_stats_kernel(%arg0: i32, %arg1: i32, %arg2: i32, %arg3: memref<128x256xbf16, #tpu.memory_space<vmem>>, %arg4: memref<256x128xbf16, #tpu.memory_space<vmem>>, %arg5: memref<128x128xbf16, #tpu.memory_space<vmem>>, %arg6: memref<1x128xf32, #tpu.memory_space<vmem>>, %arg7: memref<1x128xf32, #tpu.memory_space<vmem>>, %arg8: memref<128x128xf32, #tpu.memory_space<vmem>>) attributes {dimension_semantics = [#tpu.dimension_semantics<parallel>, #tpu.dimension_semantics<arbitrary>, #tpu.dimension_semantics<arbitrary>], iteration_bounds = array<i64: 1, 1, 1>, scalar_prefetch = 0 : i64, scratch_operands = 1 : i64, tpu.core_type = #tpu.core_type<tc>, window_params = [{transform_indices = @transform_0, window_bounds = array<i64: 128, 256>}, {transform_indices = @transform_1, window_bounds = array<i64: 256, 128>}, {transform_indices = @transform_2, window_bounds = array<i64: 128, 128>}, {transform_indices = @transform_3, window_bounds = array<i64: 1, 128>}, {transform_indices = @transform_4, window_bounds = array<i64: 1, 128>}]} {
    %c0_i32 = arith.constant 0 : i32
    %0 = arith.cmpi eq, %arg1, %c0_i32 : i32
    %c0_i32_0 = arith.constant 0 : i32
    %1 = arith.cmpi eq, %arg2, %c0_i32_0 : i32
    %2 = arith.andi %0, %1 : i1
    %3 = arith.extui %2 : i1 to i32
    %c0_i32_1 = arith.constant 0 : i32
    %4 = arith.cmpi ne, %3, %c0_i32_1 : i32
    scf.if %4 {
      %cst_13 = arith.constant 0.000000e+00 : f32
      %17 = vector.broadcast %cst_13 : f32 to vector<1x128xf32>
      %c0_14 = arith.constant 0 : index
      %c0_15 = arith.constant 0 : index
      %18 = vector.load %arg6[%c0_14, %c0_15] : memref<1x128xf32, #tpu.memory_space<vmem>>, vector<1x128xf32>
      tpu.vector_store %arg6[%c0_14, %c0_15], %17 {strides = array<i32>} : memref<1x128xf32, #tpu.memory_space<vmem>>, vector<1x128xf32>,
      %cst_16 = arith.constant 0.000000e+00 : f32
      %19 = vector.broadcast %cst_16 : f32 to vector<1x128xf32>
      %c0_17 = arith.constant 0 : index
      %c0_18 = arith.constant 0 : index
      %20 = vector.load %arg7[%c0_17, %c0_18] : memref<1x128xf32, #tpu.memory_space<vmem>>, vector<1x128xf32>
      tpu.vector_store %arg7[%c0_17, %c0_18], %19 {strides = array<i32>} : memref<1x128xf32, #tpu.memory_space<vmem>>, vector<1x128xf32>,
    } else {
    }
    %c0_i32_2 = arith.constant 0 : i32
    %5 = arith.cmpi eq, %arg2, %c0_i32_2 : i32
    %6 = arith.extui %5 : i1 to i32
    %c0_i32_3 = arith.constant 0 : i32
    %7 = arith.cmpi ne, %6, %c0_i32_3 : i32
    scf.if %7 {
      %cst_13 = arith.constant 0.000000e+00 : f32
      %17 = vector.broadcast %cst_13 : f32 to vector<128x128xf32>
      %c0_14 = arith.constant 0 : index
      %c0_15 = arith.constant 0 : index
      %18 = vector.load %arg8[%c0_14, %c0_15] : memref<128x128xf32, #tpu.memory_space<vmem>>, vector<128x128xf32>
      tpu.vector_store %arg8[%c0_14, %c0_15], %17 {strides = array<i32>} : memref<128x128xf32, #tpu.memory_space<vmem>>, vector<128x128xf32>,
    } else {
    }
    %c0 = arith.constant 0 : index
    %c0_4 = arith.constant 0 : index
    %8 = vector.load %arg3[%c0, %c0_4] : memref<128x256xbf16, #tpu.memory_space<vmem>>, vector<128x256xbf16>
    %c0_5 = arith.constant 0 : index
    %c0_6 = arith.constant 0 : index
    %9 = vector.load %arg8[%c0_5, %c0_6] : memref<128x128xf32, #tpu.memory_space<vmem>>, vector<128x128xf32>
    %c0_7 = arith.constant 0 : index
    %c0_8 = arith.constant 0 : index
    %10 = vector.load %arg4[%c0_7, %c0_8] : memref<256x128xbf16, #tpu.memory_space<vmem>>, vector<256x128xbf16>
    %cst = arith.constant dense<0.000000e+00> : vector<128x128xf32>
    %11 = tpu.matmul %8, %10, %cst {dimension_numbers = #tpu.dot_dimension_numbers<[1], [0], [0], [1], [0, 0, 1, 1], [], []>} : vector<128x256xbf16>, vector<256x128xbf16>, vector<128x128xf32> -> vector<128x128xf32>
    %12 = arith.addf %9, %11 : vector<128x128xf32>
    %c0_9 = arith.constant 0 : index
    %c0_10 = arith.constant 0 : index
    %13 = vector.load %arg8[%c0_9, %c0_10] : memref<128x128xf32, #tpu.memory_space<vmem>>, vector<128x128xf32>
    tpu.vector_store %arg8[%c0_9, %c0_10], %12 {strides = array<i32>} : memref<128x128xf32, #tpu.memory_space<vmem>>, vector<128x128xf32>,
    %c0_i32_11 = arith.constant 0 : i32
    %14 = arith.cmpi eq, %arg2, %c0_i32_11 : i32
    %15 = arith.extui %14 : i1 to i32
    %c0_i32_12 = arith.constant 0 : i32
    %16 = arith.cmpi ne, %15, %c0_i32_12 : i32
    scf.if %16 {
      %c0_13 = arith.constant 0 : index
      %c0_14 = arith.constant 0 : index
      %17 = vector.load %arg8[%c0_13, %c0_14] : memref<128x128xf32, #tpu.memory_space<vmem>>, vector<128x128xf32>
      %18 = arith.truncf %17 : vector<128x128xf32> to vector<128x128xbf16>
      %c0_15 = arith.constant 0 : index
      %c0_16 = arith.constant 0 : index
      %19 = vector.load %arg5[%c0_15, %c0_16] : memref<128x128xbf16, #tpu.memory_space<vmem>>, vector<128x128xbf16>
      tpu.vector_store %arg5[%c0_15, %c0_16], %18 {strides = array<i32>} : memref<128x128xbf16, #tpu.memory_space<vmem>>, vector<128x128xbf16>,
      %c0_17 = arith.constant 0 : index
      %c0_18 = arith.constant 0 : index
      %20 = vector.load %arg6[%c0_17, %c0_18] : memref<1x128xf32, #tpu.memory_space<vmem>>, vector<1x128xf32>
      %cst_19 = arith.constant dense<0.000000e+00> : vector<128xf32>
      %21 = vector.multi_reduction <add>, %17, %cst_19 [0] : vector<128x128xf32> to vector<128xf32>
      %22 = vector.shape_cast %21 : vector<128xf32> to vector<1x128xf32>
      %23 = arith.addf %20, %22 : vector<1x128xf32>
      %c0_20 = arith.constant 0 : index
      %c0_21 = arith.constant 0 : index
      %24 = vector.load %arg6[%c0_20, %c0_21] : memref<1x128xf32, #tpu.memory_space<vmem>>, vector<1x128xf32>
      tpu.vector_store %arg6[%c0_20, %c0_21], %23 {strides = array<i32>} : memref<1x128xf32, #tpu.memory_space<vmem>>, vector<1x128xf32>,
      %c0_22 = arith.constant 0 : index
      %c0_23 = arith.constant 0 : index
      %25 = vector.load %arg7[%c0_22, %c0_23] : memref<1x128xf32, #tpu.memory_space<vmem>>, vector<1x128xf32>
      %26 = arith.mulf %17, %17 : vector<128x128xf32>
      %cst_24 = arith.constant dense<0.000000e+00> : vector<128xf32>
      %27 = vector.multi_reduction <add>, %26, %cst_24 [0] : vector<128x128xf32> to vector<128xf32>
      %28 = vector.shape_cast %27 : vector<128xf32> to vector<1x128xf32>
      %29 = arith.addf %25, %28 : vector<1x128xf32>
      %c0_25 = arith.constant 0 : index
      %c0_26 = arith.constant 0 : index
      %30 = vector.load %arg7[%c0_25, %c0_26] : memref<1x128xf32, #tpu.memory_space<vmem>>, vector<1x128xf32>
      tpu.vector_store %arg7[%c0_25, %c0_26], %29 {strides = array<i32>} : memref<1x128xf32, #tpu.memory_space<vmem>>, vector<1x128xf32>,
    } else {
    }
    return
  }
  func.func @transform_0(%arg0: i32, %arg1: i32, %arg2: i32) -> (i32, i32) {
    %c0_i32 = arith.constant 0 : i32
    return %arg1, %arg2 : i32, i32
  }
  func.func @transform_1(%arg0: i32, %arg1: i32, %arg2: i32) -> (i32, i32) {
    %c0_i32 = arith.constant 0 : i32
    return %arg2, %arg0 : i32, i32
  }
  func.func @transform_2(%arg0: i32, %arg1: i32, %arg2: i32) -> (i32, i32) {
    %c0_i32 = arith.constant 0 : i32
    return %arg1, %arg0 : i32, i32
  }
  func.func @transform_3(%arg0: i32, %arg1: i32, %arg2: i32) -> (i32, i32) {
    %c0_i32 = arith.constant 0 : i32
    %c0_i32_0 = arith.constant 0 : i32
    return %c0_i32, %arg0 : i32, i32
  }
  func.func @transform_4(%arg0: i32, %arg1: i32, %arg2: i32) -> (i32, i32) {
    %c0_i32 = arith.constant 0 : i32
    %c0_i32_0 = arith.constant 0 : i32
    return %c0_i32, %arg0 : i32, i32
  }
}

</mosaic_0001>

<bundles_post_ra>
// kernel: tpu_custom_call.1
= control target key start
LH: loop header
LB: loop body
LE: loop exit
PB: predicated region body
PF: predicated region fallthrough
CT: control target
= control target key end

     0   :  { %10 = vsyncpa [#allocation4], 0  ;;  %s1147_s0 = inlined_call_operand.hbm [shape: bf16[128,256], index: 0, kind: input, shape index: {}]   ;;  %s1148_s1 = inlined_call_operand.hbm [shape: bf16[256,128], index: 1, kind: input, shape index: {}]   ;;  %s1149_s2 = inlined_call_operand.hbm [shape: bf16[128,128], index: 2, kind: output, shape index: {0}]   ;;  %s1150_s3 = inlined_call_operand.hbm [shape: f32[1,128], index: 3, kind: output, shape index: {1}]   ;;  %s1151_s4 = inlined_call_operand.hbm [shape: f32[1,128], index: 4, kind: output, shape index: {2}]  }
   0x1   :  { %11 = vsyncpa [#allocation7], 0 }
   0x2   :  { %12 = vsyncpa [#allocation5], 0 }
   0x3   :  { %13 = vsyncpa [#allocation10], 0  ;;  %s1008_s15 = smov [#allocation3]   ;;  %s890_s19 = scalar_lea.hbm %s1147_s0, 2048 }
   0x4   :  { %s19_s16 = sshll.u32 %s1008_s15, 4  ;;  %p891_p0 = scmp.ne.s32.totalorder %s1147_s0, %s890_s19  ;;  %s20_s16 = int_to_ptr.vmem [resolvable:$true] %s19_s16 }
   0x5   :  { %p894_p1 = scmp.lt.u32.totalorder %s890_s19, %s1147_s0 }
   0x7   :  { %p896_p2 = pnand %p894_p1, %p891_p0 }
   0x9   :  { %899 = shalt.err (!%p896_p2)
}
   0xa   :  { %s900_s24 = scalar_lea.vmem %s20_s16, 2048  ;;  %p905_p4 = scmp.lt.s32.totalorder %s20_s16, %s20_s16 }
   0xb   :  { %p901_p3 = scmp.ne.s32.totalorder %s20_s16, %s900_s24  ;;  %p906_p5 = scmp.lt.s32.totalorder %s900_s24, %s900_s24 }
   0xd   :  { %p907_p6 = por %p906_p5, %p905_p4 }
   0xf   :  { %p908_p7 = pnand %p907_p6, %p901_p3 }
  0x11   :  { %911 = shalt.err (!%p908_p7)
}
  0x12   :  { %s1009_s25 = smov 128   ;;  %s1010_s26 = smov 8  }
  0x13   :  { %25 = dma.hbm_to_vmem [thread:$0]  %s1147_s0, 2048, %s20_s16, [#allocation4], %s1009_s25, %s1009_s25, %s1010_s26  }
  0x14   :  { %s1011_s29 = smov [#allocation6]   ;;  %s912_s7 = scalar_lea.hbm %s1148_s1, 2048 }
  0x15   :  { %s31_s30 = sshll.u32 %s1011_s29, 4  ;;  %p913_p8 = scmp.ne.s32.totalorder %s1148_s1, %s912_s7  ;;  %s32_s30 = int_to_ptr.vmem [resolvable:$true] %s31_s30 }
  0x16   :  { %p916_p9 = scmp.lt.u32.totalorder %s912_s7, %s1148_s1 }
  0x18   :  { %p918_p10 = pnand %p916_p9, %p913_p8 }
  0x1a   :  { %921 = shalt.err (!%p918_p10)
}
  0x1b   :  { %s922_s12 = scalar_lea.vmem %s32_s30, 2048  ;;  %p927_p12 = scmp.lt.s32.totalorder %s32_s30, %s32_s30 }
  0x1c   :  { %p923_p11 = scmp.ne.s32.totalorder %s32_s30, %s922_s12  ;;  %p928_p13 = scmp.lt.s32.totalorder %s922_s12, %s922_s12 }
  0x1e   :  { %p929_p0 = por %p928_p13, %p927_p12 }
  0x20   :  { %p930_p1 = pnand %p929_p0, %p923_p11 }
  0x22   :  { %933 = shalt.err (!%p930_p1)
}
  0x23   :  { %s1012_s0 = smov 64   ;;  %s1013_s13 = smov 4  }
  0x24   :  { %37 = dma.hbm_to_vmem [thread:$0]  %s1148_s1, 2048, %s32_s30, [#allocation7], %s1012_s0, %s1012_s0, %s1013_s13  }
  0x25   :  { %1000 = dma.done.wait [#allocation4], 2048  }
  0x26   :  { %1001 = vsyncadd [#allocation4], 4294965248 }
  0x27   :  { %1002 = dma.done.wait [#allocation7], 2048  }
  0x28   :  { %1003 = vsyncadd [#allocation7], 4294965248  ;;  %v850_v0 = vld [vmem:[#allocation6 + $0x40] sm:$0xff]   ;;  %v852_v2 = vld [vmem:[#allocation6 + $0x48] sm:$0xff]   ;;  %v1014_v32 = vmov 0.0   ;;  %s1015_s1 = smov [#allocation8]  }
  0x29   :  { %v851_v1 = vld [vmem:[#allocation6] sm:$0xff]   ;;  %760 = vmatprep.subr.bf16.mxu0 %v850_v0  ;;  %824 = vmatprep.subr.bf16.mxu1 %v850_v0  ;;  %v853_v3 = vld [vmem:[#allocation6 + $0x8] sm:$0xff]   ;;  %v854_v4 = vld [vmem:[#allocation6 + $0x50] sm:$0xff]   ;;  %51 = vst [vmem:[#allocation9] sm:$0x1] %v1014_v32  ;;  %s609_s16 = sshll.u32 %s1015_s1, 4  ;;  %s610_s16 = int_to_ptr.vmem [resolvable:$true] %s609_s16 }
  0x2a   :  { %761 = vmatpush3.bf16.msra.mxu0 %v851_v1  ;;  %832 = vmatpush3.bf16.msra.mxu1 %v851_v1  ;;  %v855_v5 = vld [vmem:[#allocation6 + $0x10] sm:$0xff]   ;;  %v856_v6 = vld [vmem:[#allocation6 + $0x58] sm:$0xff]   ;;  %v858_v8 = vld [vmem:[#allocation6 + $0x60] sm:$0xff]   ;;  %52 = vst [vmem:[#allocation11] sm:$0x1] %v1014_v32  ;;  %s934_s17 = scalar_lea.vmem %s610_s16, 1024  ;;  %p939_p3 = scmp.lt.s32.totalorder %s610_s16, %s610_s16 }
  0x2b   :  { %762 = vmatprep.subr.bf16.mxu0 %v852_v2  ;;  %825 = vmatprep.subr.bf16.mxu1 %v852_v2  ;;  %v857_v7 = vld [vmem:[#allocation6 + $0x18] sm:$0xff]   ;;  %v859_v9 = vld [vmem:[#allocation6 + $0x20] sm:$0xff]   ;;  %v860_v10 = vld [vmem:[#allocation6 + $0x68] sm:$0xff]   ;;  %p935_p2 = scmp.ne.s32.totalorder %s610_s16, %s934_s17  ;;  %p940_p4 = scmp.lt.s32.totalorder %s934_s17, %s934_s17 }
  0x2c   :  { %v868_v11 = vld [vmem:[#allocation3 + $0x4] ss:$8 sps:$4 sm:$0xff]   ;;  %v862_v14 = vld [vmem:[#allocation6 + $0x70] sm:$0xff]   ;;  %v864_v16 = vld [vmem:[#allocation6 + $0x78] sm:$0xff]  }
  0x2d   :  { %v861_v12 = vld [vmem:[#allocation6 + $0x28] sm:$0xff]   ;;  %344 = vmatprep.mubr.bf16.mxu0 %v868_v11  ;;  %v863_v15 = vld [vmem:[#allocation6 + $0x30] sm:$0xff]   ;;  %v865_v17 = vld [vmem:[#allocation6 + $0x38] sm:$0xff]   ;;  %p941_p5 = por %p940_p4, %p939_p3 }
  0x2e   :  { %763 = vmatpush3.bf16.msra.mxu0 %v853_v3  ;;  %833 = vmatpush3.bf16.msra.mxu1 %v853_v3  ;;  %v874_v13 = vld [vmem:[#allocation3 + $0x44] ss:$8 sps:$4 sm:$0xff]   ;;  %v866_v18 = vld [vmem:[#allocation3] ss:$8 sps:$4 sm:$0xff]   ;;  %v869_v20 = vld [vmem:[#allocation3 + $0x14] ss:$8 sps:$4 sm:$0xff]  }
  0x2f   :  { %764 = vmatprep.subr.bf16.mxu0 %v854_v4  ;;  %826 = vmatprep.subr.bf16.mxu1 %v854_v4  ;;  %v872_v19 = vld [vmem:[#allocation3 + $0x40] ss:$8 sps:$4 sm:$0xff]   ;;  %v878_v21 = vld [vmem:[#allocation3 + $0x54] ss:$8 sps:$4 sm:$0xff]   ;;  %v871_v22 = vld [vmem:[#allocation3 + $0x10] ss:$8 sps:$4 sm:$0xff]   ;;  %p942_p6 = pnand %p941_p5, %p935_p2 }
  0x30   :  { %376 = vmatprep.mubr.bf16.mxu1 %v874_v13  ;;  %v880_v23 = vld [vmem:[#allocation3 + $0x50] ss:$8 sps:$4 sm:$0xff]   ;;  %v875_v24 = vld [vmem:[#allocation3 + $0x24] ss:$8 sps:$4 sm:$0xff]   ;;  %v877_v26 = vld [vmem:[#allocation3 + $0x20] ss:$8 sps:$4 sm:$0xff]  }
  0x31   :  { %v884_v25 = vld [vmem:[#allocation3 + $0x64] ss:$8 sps:$4 sm:$0xff]   ;;  %v886_v27 = vld [vmem:[#allocation3 + $0x60] ss:$8 sps:$4 sm:$0xff]   ;;  %v881_v28 = vld [vmem:[#allocation3 + $0x34] ss:$8 sps:$4 sm:$0xff]  }
  0x32   :  { %765 = vmatpush3.bf16.msra.mxu0 %v855_v5  ;;  %834 = vmatpush3.bf16.msra.mxu1 %v855_v5  ;;  %v887_v29 = vld [vmem:[#allocation3 + $0x74] ss:$8 sps:$4 sm:$0xff]   ;;  %v883_v30 = vld [vmem:[#allocation3 + $0x30] ss:$8 sps:$4 sm:$0xff]  }
  0x33   :  { %766 = vmatprep.subr.bf16.mxu0 %v856_v6  ;;  %827 = vmatprep.subr.bf16.mxu1 %v856_v6  ;;  %v889_v31 = vld [vmem:[#allocation3 + $0x70] ss:$8 sps:$4 sm:$0xff]  }
  0x36   :  { %767 = vmatpush3.bf16.msra.mxu0 %v857_v7  ;;  %835 = vmatpush3.bf16.msra.mxu1 %v857_v7 }
  0x37   :  { %768 = vmatprep.subr.bf16.mxu0 %v858_v8  ;;  %828 = vmatprep.subr.bf16.mxu1 %v858_v8 }
  0x3a   :  { %769 = vmatpush3.bf16.msra.mxu0 %v859_v9  ;;  %836 = vmatpush3.bf16.msra.mxu1 %v859_v9 }
  0x3b   :  { %770 = vmatprep.subr.bf16.mxu0 %v860_v10  ;;  %829 = vmatprep.subr.bf16.mxu1 %v860_v10 }
  0x3e   :  { %771 = vmatpush3.bf16.msra.mxu0 %v861_v12  ;;  %837 = vmatpush3.bf16.msra.mxu1 %v861_v12 }
  0x3f   :  { %772 = vmatprep.subr.bf16.mxu0 %v862_v14  ;;  %830 = vmatprep.subr.bf16.mxu1 %v862_v14 }
  0x42   :  { %773 = vmatpush3.bf16.msra.mxu0 %v863_v15  ;;  %838 = vmatpush3.bf16.msra.mxu1 %v863_v15 }
  0x43   :  { %774 = vmatprep.subr.bf16.mxu0 %v864_v16  ;;  %831 = vmatprep.subr.bf16.mxu1 %v864_v16 }
  0x46   :  { %775 = vmatpush3.bf16.msra.mxu0 %v865_v17  ;;  %839 = vmatpush3.bf16.msra.mxu1 %v865_v17 }
  0x49   :  { %345 = vmatmul.mubr.bf16.vlgmr.msra.gmra.mrb[0].mxu0 %v866_v18  ;;  %377 = vmatmul.mubr.bf16.vlgmr.msra.gmra.mrb[0].mxu1 %v872_v19 }
  0x4a   :  { %352 = vmatprep.mubr.bf16.mxu0 %v869_v20  ;;  %384 = vmatprep.mubr.bf16.mxu1 %v878_v21 }
  0x51   :  { %353 = vmatmul.mubr.bf16.gmra.mrb[4].mxu0 %v871_v22  ;;  %385 = vmatmul.mubr.bf16.gmra.mrb[4].mxu1 %v880_v23 }
  0x52   :  { %360 = vmatprep.mubr.bf16.mxu0 %v875_v24  ;;  %392 = vmatprep.mubr.bf16.mxu1 %v884_v25 }
  0x59   :  { %361 = vmatmul.mubr.bf16.gmra.mrb[8].mxu0 %v877_v26  ;;  %393 = vmatmul.mubr.bf16.gmra.mrb[8].mxu1 %v886_v27 }
  0x5a   :  { %368 = vmatprep.mubr.bf16.mxu0 %v881_v28  ;;  %400 = vmatprep.mubr.bf16.mxu1 %v887_v29 }
  0x61   :  { %369 = vmatmul.mubr.bf16.gmra.mrb[12].mxu0 %v883_v30  ;;  %401 = vmatmul.mubr.bf16.gmra.mrb[12].mxu1 %v889_v31 }
 0x11c   :  { %v776_v33 = vpop.f32.mrb[0].mxu0  ;;  %v800_v34 = vpop.f32.mrb[0].mxu1 }
 0x11d   :  { %v777_v35 = vpop.f32.mrb[1].mxu0  ;;  %v801_v36 = vpop.f32.mrb[1].mxu1 }
 0x11e   :  { %v778_v37 = vadd.f32 %v777_v35, %v776_v33  ;;  %v779_v38 = vpop.f32.mrb[2].mxu0  ;;  %v1070_v39 = vadd.f32 %v801_v36, %v800_v34  ;;  %v803_v40 = vpop.f32.mrb[2].mxu1 }
 0x11f   :  { %v780_v41 = vpop.f32.mrb[3].mxu0  ;;  %v804_v42 = vpop.f32.mrb[3].mxu1 }
 0x120   :  { %v781_v43 = vadd.f32 %v780_v41, %v779_v38  ;;  %v1072_v44 = vadd.f32 %v804_v42, %v803_v40  ;;  %v565_v45 = vmul.f32 %v778_v37, %v778_v37 }
 0x122   :  { %v716_v46 = vpack.c.bf16 %v781_v43, %v778_v37  ;;  %v541_v47 = vadd.f32 %v781_v43, %v778_v37  ;;  %v566_v48 = vmul.f32 %v781_v43, %v781_v43  ;;  %v736_v49 = vpack.c.bf16 %v1072_v44, %v1070_v39 }
 0x124   :  { %717 = vst [vmem:[#allocation8] sm:$0xff] %v716_v46   ;;  %v581_v50 = vadd.f32 %v566_v48, %v565_v45  ;;  %v782_v51 = vpop.f32.mrb[4].mxu0  ;;  %756 = vst [vmem:[#allocation8 + $0x20] sm:$0xff] %v736_v49   ;;  %v806_v52 = vpop.f32.mrb[4].mxu1  ;;  %v573_v48 = vmul.f32 %v1070_v39, %v1070_v39 }
 0x125   :  { %v783_v53 = vpop.f32.mrb[5].mxu0  ;;  %v807_v54 = vpop.f32.mrb[5].mxu1 }
 0x126   :  { %v784_v55 = vadd.f32 %v783_v53, %v782_v51  ;;  %v785_v56 = vpop.f32.mrb[6].mxu0  ;;  %v1076_v57 = vadd.f32 %v807_v54, %v806_v52  ;;  %v809_v58 = vpop.f32.mrb[6].mxu1  ;;  %v574_v51 = vmul.f32 %v1072_v44, %v1072_v44 }
 0x127   :  { %v786_v59 = vpop.f32.mrb[7].mxu0  ;;  %v810_v60 = vpop.f32.mrb[7].mxu1 }
 0x128   :  { %v542_v61 = vadd.f32 %v784_v55, %v541_v47  ;;  %v567_v62 = vmul.f32 %v784_v55, %v784_v55  ;;  %v787_v63 = vadd.f32 %v786_v59, %v785_v56  ;;  %v1078_v0 = vadd.f32 %v810_v60, %v809_v58 }
 0x12a   :  { %v582_v1 = vadd.f32 %v581_v50, %v567_v62  ;;  %v721_v2 = vpack.c.bf16 %v787_v63, %v784_v55  ;;  %v543_v3 = vadd.f32 %v787_v63, %v542_v61  ;;  %v568_v4 = vmul.f32 %v787_v63, %v787_v63 }
 0x12b   :  { %v741_v5 = vpack.c.bf16 %v1078_v0, %v1076_v57 }
 0x12c   :  { %753 = vst [vmem:[#allocation8 + $0x8] sm:$0xff] %v721_v2   ;;  %v583_v6 = vadd.f32 %v582_v1, %v568_v4  ;;  %v788_v7 = vpop.f32.mrb[8].mxu0  ;;  %v812_v8 = vpop.f32.mrb[8].mxu1 }
 0x12d   :  { %v789_v9 = vpop.f32.mrb[9].mxu0  ;;  %757 = vst [vmem:[#allocation8 + $0x28] sm:$0xff] %v741_v5   ;;  %v813_v10 = vpop.f32.mrb[9].mxu1 }
 0x12e   :  { %v790_v11 = vadd.f32 %v789_v9, %v788_v7  ;;  %v791_v12 = vpop.f32.mrb[10].mxu0  ;;  %v1082_v13 = vadd.f32 %v813_v10, %v812_v8  ;;  %v815_v14 = vpop.f32.mrb[10].mxu1 }
 0x12f   :  { %v792_v15 = vpop.f32.mrb[11].mxu0  ;;  %v816_v16 = vpop.f32.mrb[11].mxu1 }
 0x130   :  { %v544_v17 = vadd.f32 %v790_v11, %v543_v3  ;;  %v569_v18 = vmul.f32 %v790_v11, %v790_v11  ;;  %v793_v19 = vadd.f32 %v792_v15, %v791_v12  ;;  %v817_v20 = vadd.f32 %v816_v16, %v815_v14 }
 0x132   :  { %v584_v21 = vadd.f32 %v583_v6, %v569_v18  ;;  %v726_v22 = vpack.c.bf16 %v793_v19, %v790_v11  ;;  %v545_v23 = vadd.f32 %v793_v19, %v544_v17  ;;  %v570_v24 = vmul.f32 %v793_v19, %v793_v19 }
 0x133   :  { %v746_v25 = vpack.c.bf16 %v817_v20, %v1082_v13 }
 0x134   :  { %754 = vst [vmem:[#allocation8 + $0x10] sm:$0xff] %v726_v22   ;;  %v585_v26 = vadd.f32 %v584_v21, %v570_v24  ;;  %v794_v27 = vpop.f32.mrb[12].mxu0  ;;  %v818_v28 = vpop.f32.mrb[12].mxu1 }
 0x135   :  { %v795_v29 = vpop.f32.mrb[13].mxu0  ;;  %758 = vst [vmem:[#allocation8 + $0x30] sm:$0xff] %v746_v25   ;;  %v819_v30 = vpop.f32.mrb[13].mxu1 }
 0x136   :  { %v796_v31 = vadd.f32 %v795_v29, %v794_v27  ;;  %v797_v32 = vpop.f32.mrb[14].mxu0  ;;  %v820_v33 = vadd.f32 %v819_v30, %v818_v28  ;;  %v821_v34 = vpop.f32.mrb[14].mxu1 }
 0x137   :  { %v798_v35 = vpop.f32.mrb[15].mxu0  ;;  %v822_v36 = vpop.f32.mrb[15].mxu1 }
 0x138   :  { %v546_v37 = vadd.f32 %v796_v31, %v545_v23  ;;  %v571_v38 = vmul.f32 %v796_v31, %v796_v31  ;;  %v799_v40 = vadd.f32 %v798_v35, %v797_v32  ;;  %v823_v41 = vadd.f32 %v822_v36, %v821_v34 }
 0x13a   :  { %v586_v42 = vadd.f32 %v585_v26, %v571_v38  ;;  %v731_v43 = vpack.c.bf16 %v799_v40, %v796_v31  ;;  %v547_v45 = vadd.f32 %v799_v40, %v546_v37  ;;  %v572_v46 = vmul.f32 %v799_v40, %v799_v40 }
 0x13b   :  { %v751_v47 = vpack.c.bf16 %v823_v41, %v820_v33 }
 0x13c   :  { %755 = vst [vmem:[#allocation8 + $0x18] sm:$0xff] %v731_v43   ;;  %v548_v49 = vadd.f32 %v1070_v39, %v547_v45  ;;  %v587_v50 = vadd.f32 %v586_v42, %v572_v46 }
 0x13d   :  { %759 = vst [vmem:[#allocation8 + $0x38] sm:$0xff] %v751_v47  }
 0x13e   :  { %v549_v52 = vadd.f32 %v1072_v44, %v548_v49  ;;  %v588_v53 = vadd.f32 %v587_v50, %v573_v48 }
 0x13f   :  { %945 = shalt.err (!%p942_p6)
}
 0x140   :  { %s946_s20 = scalar_lea.hbm %s1149_s2, 1024 }
 0x141   :  { %p947_p7 = scmp.ne.s32.totalorder %s1149_s2, %s946_s20  ;;  %p950_p8 = scmp.lt.u32.totalorder %s946_s20, %s1149_s2 }
 0x143   :  { %p952_p9 = pnand %p950_p8, %p947_p7 }
 0x145   :  { %955 = shalt.err (!%p952_p9)
}
 0x146   :  { %615 = dma.vmem_to_hbm [thread:$0]  %s610_s16, 1024, %s1149_s2, [#allocation5], %s1012_s0, %s1012_s0, %s1013_s13   ;;  %v575_v39 = vmul.f32 %v1076_v57, %v1076_v57  ;;  %v589_v44 = vadd.f32 %v588_v53, %v574_v51  ;;  %v550_v54 = vadd.f32 %v1076_v57, %v549_v52  ;;  %v576_v55 = vmul.f32 %v1078_v0, %v1078_v0  ;;  %v540_v16 = vld [vmem:[#allocation9] sm:$0x1]  ;;  %v564_v19 = vld [vmem:[#allocation11] sm:$0x1] }
 0x147   :  { %v577_v60 = vmul.f32 %v1082_v13, %v1082_v13  ;;  %v578_v1 = vmul.f32 %v817_v20, %v817_v20  ;;  %v579_v2 = vmul.f32 %v820_v33, %v820_v33  ;;  %v580_v6 = vmul.f32 %v823_v41, %v823_v41  ;;  %s1016_s2 = smov [#allocation9]   ;;  %s1017_s28 = smov [#allocation11]  }
 0x148   :  { %v551_v56 = vadd.f32 %v1078_v0, %v550_v54  ;;  %v590_v58 = vadd.f32 %v589_v44, %v575_v39  ;;  %s622_s27 = sshll.u32 %s1016_s2, 4  ;;  %s632_s29 = sshll.u32 %s1017_s28, 4  ;;  %s623_s27 = int_to_ptr.vmem [resolvable:$true] %s622_s27  ;;  %s1115_s29 = int_to_ptr.vmem [resolvable:$true] %s632_s29 }
 0x149   :  { %s956_s30 = scalar_lea.vmem %s623_s27, 16  ;;  %s960_s5 = scalar_lea.vmem %s623_s27, 32 }
 0x14a   :  { %v552_v59 = vadd.f32 %v1082_v13, %v551_v56  ;;  %v591_v61 = vadd.f32 %v590_v58, %v576_v55  ;;  %p957_p10 = scmp.ne.s32.totalorder %s623_s27, %s956_s30  ;;  %p961_p11 = scmp.lt.s32.totalorder %s623_s27, %s623_s27 }
 0x14b   :  { %p962_p12 = scmp.lt.s32.totalorder %s960_s5, %s956_s30 }
 0x14c   :  { %v592_v62 = vadd.f32 %v591_v61, %v577_v60  ;;  %v553_v63 = vadd.f32 %v817_v20, %v552_v59 }
 0x14d   :  { %p963_p13 = por %p962_p12, %p961_p11 }
 0x14e   :  { %v593_v3 = vadd.f32 %v592_v62, %v578_v1  ;;  %v554_v4 = vadd.f32 %v820_v33, %v553_v63 }
 0x14f   :  { %p964_p0 = pnand %p963_p13, %p957_p10 }
 0x150   :  { %v594_v5 = vadd.f32 %v593_v3, %v579_v2  ;;  %v555_v57 = vadd.f32 %v823_v41, %v554_v4 }
 0x152   :  { %v556_v7 = vrot.slane %v555_v57, 4  ;;  %v595_v8 = vadd.f32 %v594_v5, %v580_v6 }
 0x154   :  { %v557_v9 = vadd.f32 %v556_v7, %v555_v57  ;;  %v596_v0 = vrot.slane %v595_v8, 4 }
 0x156   :  { %v558_v10 = vrot.slane %v557_v9, 2  ;;  %v597_v11 = vadd.f32 %v596_v0, %v595_v8 }
 0x158   :  { %v559_v12 = vadd.f32 %v558_v10, %v557_v9  ;;  %v598_v14 = vrot.slane %v597_v11, 2 }
 0x15a   :  { %v599_v15 = vadd.f32 %v598_v14, %v597_v11  ;;  %v560_v13 = vrot.slane %v559_v12, 1 }
 0x15c   :  { %v561_v17 = vadd.f32 %v560_v13, %v559_v12  ;;  %v600_v18 = vrot.slane %v599_v15, 1 }
 0x15e   :  { %v562_v20 = vadd.f32 %v561_v17, %v540_v16  ;;  %v601_v21 = vadd.f32 %v600_v18, %v599_v15 }
 0x160   :  { %563 = vst [vmem:[#allocation9] sm:$0x1] %v562_v20  ;;  %v602_v22 = vadd.f32 %v601_v21, %v564_v19 }
 0x161   :  { %967 = shalt.err (!%p964_p0)
}
 0x162   :  { %s968_s8 = scalar_lea.hbm %s1150_s3, 16 }
 0x163   :  { %p969_p1 = scmp.ne.s32.totalorder %s1150_s3, %s968_s8  ;;  %p972_p2 = scmp.lt.u32.totalorder %s968_s8, %s1150_s3 }
 0x165   :  { %p974_p3 = pnand %p972_p2, %p969_p1 }
 0x167   :  { %977 = shalt.err (!%p974_p3)
}
 0x168   :  { %625 = dma.vmem_to_hbm [thread:$0]  %s623_s27, 16, %s1150_s3, [#allocation10]   ;;  %603 = vst [vmem:[#allocation11] sm:$0x1] %v602_v22 }
 0x169   :  { %s978_s14 = scalar_lea.vmem %s1115_s29, 16  ;;  %s982_s15 = scalar_lea.vmem %s1115_s29, 32 }
 0x16a   :  { %p979_p4 = scmp.ne.s32.totalorder %s1115_s29, %s978_s14  ;;  %p983_p5 = scmp.lt.s32.totalorder %s1115_s29, %s1115_s29 }
 0x16b   :  { %p984_p6 = scmp.lt.s32.totalorder %s982_s15, %s978_s14 }
 0x16d   :  { %p985_p7 = por %p984_p6, %p983_p5 }
 0x16f   :  { %p986_p8 = pnand %p985_p7, %p979_p4 }
 0x171   :  { %989 = shalt.err (!%p986_p8)
}
 0x172   :  { %s990_s17 = scalar_lea.hbm %s1151_s4, 16 }
 0x173   :  { %p991_p9 = scmp.ne.s32.totalorder %s1151_s4, %s990_s17  ;;  %p994_p10 = scmp.lt.u32.totalorder %s990_s17, %s1151_s4 }
 0x175   :  { %p996_p11 = pnand %p994_p10, %p991_p9 }
 0x177   :  { %999 = shalt.err (!%p996_p11)
}
 0x178   :  { %635 = dma.vmem_to_hbm [thread:$0]  %s1115_s29, 16, %s1151_s4, [#allocation10]  }
 0x179   :  { %1004 = dma.done.wait [#allocation5], 1024  }
 0x17a   :  { %1005 = vsyncadd [#allocation5], 4294966272 }
 0x17b   :  { %1006 = dma.done.wait [#allocation10], 32  }
 0x17c   :  { %1007 = vsyncadd [#allocation10], 4294967264 }
 0x17d   :  { %645 = vsyncpa [#allocation4], 1 }
 0x17e   :  { %646 = vsyncpa [#allocation7], 1 }
 0x17f   :  { %647 = vsyncpa [#allocation5], 1 }
 0x180   :  { %648 = vsyncpa [#allocation10], 1 }

</bundles_post_ra>
